<compile_context>
chip_gen: v7x
topology: tpu7x:2x2x1
jax: 0.10.0
libtpu: 0.0.40
codegen_flags: <defaults>
</compile_context>

<pallas_src>
import jax
import jax.numpy as jnp
from jax import lax
from jax.experimental import pallas as pl
from jax.experimental.pallas import tpu as pltpu


def _predict_net_kernel(x_ref, w_ref, b_ref, o_ref):
    # x_ref: (TB, D) activation tile, w_ref: (2, D) native Linear weight,
    # b_ref: (1, 2) bias row, o_ref: (TB, 2) output tile.
    x = x_ref[...]
    w = w_ref[...]
    b = b_ref[...]
    # Contract x's feature dim against w's feature dim: (TB, D) · (2, D)ᵀ -> (TB, 2)
    y = lax.dot_general(
        x, w, (((1,), (1,)), ((), ())), preferred_element_type=jnp.float32
    )
    o_ref[...] = (y + b).astype(o_ref.dtype)


def _choose_tile_rows(batch, dim, itemsize, vmem_budget_bytes=8 * 1024 * 1024):
    # Keep the double-buffered x tile (2 * TB * D * itemsize) well under the
    # scoped-VMEM defaults on every generation (16 MiB v5e is the tightest).
    max_rows = max(8, vmem_budget_bytes // max(1, 2 * dim * itemsize))
    tb = min(batch, max_rows, 1024)
    tb = max(8, (tb // 8) * 8)  # sublane (8) alignment
    return tb


def predict_net_forward(x, weight, bias, *, tile_rows=None):
    """PredictNet.forward: fc1(x) = x @ weight.T + bias.

    Args:
      x:      (B, D)
      weight: (2, D)  — native PyTorch nn.Linear weight layout (no transpose needed)
      bias:   (2,)
    Returns:
      (B, 2) with x.dtype
    """
    B, D = x.shape
    assert weight.shape == (2, D)
    assert bias.shape == (2,)
    out_dtype = x.dtype

    # NOTE: for tiny problems (e.g. B*D of a few KiB) plain `x @ weight.T + bias`
    # fused by XLA beats any Pallas launch; keep this kernel for large-B paths.
    # NOTE: if numerics allow, casting x to bf16 in the caller halves HBM traffic
    # (accumulation stays f32 via preferred_element_type).

    if tile_rows is None:
        tile_rows = _choose_tile_rows(B, D, jnp.dtype(x.dtype).itemsize)
    TB = max(8, (int(tile_rows) // 8) * 8)

    # Pad the batch so every grid step sees a full (TB, D) tile.
    num_tiles = pl.cdiv(B, TB)
    B_pad = num_tiles * TB
    if B_pad != B:
        x = jnp.pad(x, ((0, B_pad - B), (0, 0)))

    b2d = bias.reshape(1, 2).astype(jnp.float32)

    itemsize_x = jnp.dtype(x.dtype).itemsize
    cost = pl.CostEstimate(
        flops=4 * B_pad * D,  # 2 * B * D * N with N = 2
        transcendentals=0,
        bytes_accessed=(
            B_pad * D * itemsize_x
            + weight.size * jnp.dtype(weight.dtype).itemsize
            + b2d.size * 4
            + B_pad * 2 * jnp.dtype(out_dtype).itemsize
        ),
    )

    out = pl.pallas_call(
        _predict_net_kernel,
        out_shape=jax.ShapeDtypeStruct((B_pad, 2), out_dtype),
        grid_spec=pltpu.PrefetchScalarGridSpec(
            num_scalar_prefetch=0,
            grid=(num_tiles,),
            in_specs=[
                pl.BlockSpec((TB, D), lambda i: (i, 0)),  # stream x batch tiles
                pl.BlockSpec((2, D), lambda i: (0, 0)),   # weight resident in VMEM
                pl.BlockSpec((1, 2), lambda i: (0, 0)),   # bias resident in VMEM
            ],
            out_specs=pl.BlockSpec((TB, 2), lambda i: (i, 0)),
        ),
        compiler_params=pltpu.CompilerParams(
            dimension_semantics=("parallel",),  # batch tiles are independent
        ),
        cost_estimate=cost,
    )(x, weight, b2d)

    return out[:B] if B_pad != B else out


if __name__ == "__main__":
    key = jax.random.PRNGKey(0)
    k_x, k_w, k_b, k_x2 = jax.random.split(key, 4)

    batch, dim = 64, 32

    # Deterministic parameter init mimicking PyTorch nn.Linear default:
    # uniform(-1/sqrt(dim), 1/sqrt(dim)).
    bound = 1.0 / (dim ** 0.5)
    weight = jax.random.uniform(k_w, (2, dim), jnp.float32, -bound, bound)
    bias = jax.random.uniform(k_b, (2,), jnp.float32, -bound, bound)

    # Case 1: batch divisible by the tile — 4-step pipelined grid over batch.
    x = jax.random.normal(k_x, (batch, dim), jnp.float32)
    out = predict_net_forward(x, weight, bias, tile_rows=16)
    out = jax.block_until_ready(out)
    ref = x @ weight.T + bias
    assert out.shape == (batch, 2)
    assert jnp.allclose(out, ref, atol=1e-5, rtol=1e-5)

    # Case 2: ragged batch exercising the pad-and-slice path with auto tile size.
    x2 = jax.random.normal(k_x2, (37, dim), jnp.float32)
    out2 = predict_net_forward(x2, weight, bias)
    out2 = jax.block_until_ready(out2)
    ref2 = x2 @ weight.T + bias
    assert out2.shape == (37, 2)
    assert jnp.allclose(out2, ref2, atol=1e-5, rtol=1e-5)

    print("KERNEL_OK")
</pallas_src>

<mosaic_0001>
module attributes {stable_mosaic.version = 11 : i64} {
  func.func @_predict_net_kernel(%arg0: i32, %arg1: memref<16x32xf32, #tpu.memory_space<vmem>>, %arg2: memref<2x32xf32, #tpu.memory_space<vmem>>, %arg3: memref<1x2xf32, #tpu.memory_space<vmem>>, %arg4: memref<16x2xf32, #tpu.memory_space<vmem>>) attributes {dimension_semantics = [#tpu.dimension_semantics<parallel>], iteration_bounds = array<i64: 4>, scalar_prefetch = 0 : i64, scratch_operands = 0 : i64, tpu.core_type = #tpu.core_type<tc>, window_params = [{transform_indices = @transform_0, window_bounds = array<i64: 16, 32>}, {pipeline_mode = #tpu.pipeline_mode<synchronous>, transform_indices = @transform_1, window_bounds = array<i64: 2, 32>}, {pipeline_mode = #tpu.pipeline_mode<synchronous>, transform_indices = @transform_2, window_bounds = array<i64: 1, 2>}, {transform_indices = @transform_3, window_bounds = array<i64: 16, 2>}]} {
    %c0 = arith.constant 0 : index
    %c0_0 = arith.constant 0 : index
    %0 = vector.load %arg1[%c0, %c0_0] : memref<16x32xf32, #tpu.memory_space<vmem>>, vector<16x32xf32>
    %c0_1 = arith.constant 0 : index
    %c0_2 = arith.constant 0 : index
    %1 = vector.load %arg2[%c0_1, %c0_2] : memref<2x32xf32, #tpu.memory_space<vmem>>, vector<2x32xf32>
    %c0_3 = arith.constant 0 : index
    %c0_4 = arith.constant 0 : index
    %2 = vector.load %arg3[%c0_3, %c0_4] : memref<1x2xf32, #tpu.memory_space<vmem>>, vector<1x2xf32>
    %cst = arith.constant dense<0.000000e+00> : vector<16x2xf32>
    %3 = tpu.matmul %0, %1, %cst {dimension_numbers = #tpu.dot_dimension_numbers<[1], [1], [0], [0], [0, 0, 1, 0], [], []>} : vector<16x32xf32>, vector<2x32xf32>, vector<16x2xf32> -> vector<16x2xf32>
    %4 = vector.broadcast %2 : vector<1x2xf32> to vector<16x2xf32>
    %5 = arith.addf %3, %4 : vector<16x2xf32>
    %c0_5 = arith.constant 0 : index
    %c0_6 = arith.constant 0 : index
    %6 = vector.load %arg4[%c0_5, %c0_6] : memref<16x2xf32, #tpu.memory_space<vmem>>, vector<16x2xf32>
    tpu.vector_store %arg4[%c0_5, %c0_6], %5 {strides = array<i32>} : memref<16x2xf32, #tpu.memory_space<vmem>>, vector<16x2xf32>,
    return
  }
  func.func @transform_0(%arg0: i32) -> (i32, i32) {
    %c0_i32 = arith.constant 0 : i32
    %c0_i32_0 = arith.constant 0 : i32
    return %arg0, %c0_i32 : i32, i32
  }
  func.func @transform_1(%arg0: i32) -> (i32, i32) {
    %c0_i32 = arith.constant 0 : i32
    %c0_i32_0 = arith.constant 0 : i32
    %c0_i32_1 = arith.constant 0 : i32
    return %c0_i32, %c0_i32_0 : i32, i32
  }
  func.func @transform_2(%arg0: i32) -> (i32, i32) {
    %c0_i32 = arith.constant 0 : i32
    %c0_i32_0 = arith.constant 0 : i32
    %c0_i32_1 = arith.constant 0 : i32
    return %c0_i32, %c0_i32_0 : i32, i32
  }
  func.func @transform_3(%arg0: i32) -> (i32, i32) {
    %c0_i32 = arith.constant 0 : i32
    %c0_i32_0 = arith.constant 0 : i32
    return %arg0, %c0_i32 : i32, i32
  }
}

</mosaic_0001>

<bundles_post_ra>
// kernel: tpu_custom_call.1
= control target key start
LH: loop header
LB: loop body
LE: loop exit
PB: predicated region body
PF: predicated region fallthrough
CT: control target
= control target key end

     0   :  { %s387_s12 = smov 0   ;;  %s410_s0 = inlined_call_operand.vmem [shape: f32[64,32], index: 0, kind: input, shape index: {}]   ;;  %s411_s1 = inlined_call_operand.vmem [shape: f32[2,32], index: 1, kind: input, shape index: {}]   ;;  %s412_s2 = inlined_call_operand.vmem [shape: f32[1,2], index: 2, kind: input, shape index: {}]   ;;  %s413_s3 = inlined_call_operand.vmem [shape: f32[64,2], index: 3, kind: output, shape index: {}]  }
   0x1 LB: > { %s328_s13 = sadd.s32 4294967295, %s365_s12   ;;  %p332_p0 = scmp.ge.s32.totalorder %s365_s12, 1  ;;  %s365_s12 = sphi %s387_s12, %s13_s12  }
   0x2   : > { %p138_p1 = scmp.lt.s32.totalorder %s365_s12, 5 }
   0x4   : > { %p139_p2 = pnand %p332_p0, %p138_p1 }
   0x5   : > { %v176_v0 = vld [vmem:[%s411_s1] sm:$0x3] (!%p139_p2)  ;;  %vm184_vm0 = vcmask (!%p139_p2), 261120   ;;  %s333_s16 = sshll.u32 (!%p139_p2), %s328_s13, 1  ;;  %vm269_vm1 = vcmask (!%p139_p2), 15360  }
   0x6   : > { %142 = sbr.rel (%p139_p2) target bundleno = 234 (0xea), region = 32  ;;  %346 = vmatprep.subr.msk.mxu0 (!%p139_p2), %vm184_vm0, %v176_v0  ;;  %p163_p3 = scmp.lt.s32.totalorder (!%p139_p2), %s333_s16, 7  ;;  %v337_v3 = vld [vmem:[%s412_s2] ss:$0 sm:$0xff] (!%p139_p2) }
   0x7   : > { %347 = vmatpush3.xpose.msk.msra.mxu0 (!%p139_p2), %vm184_vm0, %v176_v0 }
   0xd   : > { %s415_s16 = smov (!%p163_p3, %s333_s16), 7 }
   0xe   : > { %s334_s17 = sshll.u32 %s415_s16, 3 }
   0xf   : > { %s166_s20 = scalar_lea.vmem %s410_s0, %s334_s17  ;;  %s172_s25 = scalar_lea.vmem %s413_s3, %s334_s17 }
  0x10   : > { %v174_v1 = vld [vmem:[%s166_s20] sm:$0xff]  ;;  %v175_v2 = vld [vmem:[%s166_s20 + $0x8] sm:$0xff] }
  0x11   : > { %348 = vmatprep.mubr.msk.f32.mxu0 %vm184_vm0, %v174_v1 }
  0x12   : > { %349 = vmatmul.mubr.msk.f32.vlgmr.msra.gmra.mrb[0].mxu0 %vm184_vm0, %v175_v2 }
  0xe5   : > { %v350_v4 = vpop.f32.mrb[0].mxu0 }
  0xe6   : > { %v260_v5 = vpop.f32.mrb[1].mxu0  ;;  %v266_v7 = vadd.f32 %v350_v4, %v337_v3 }
  0xe7   : > { %v261_v6 = vadd.f32 %v337_v3, %v260_v5 }
  0xe8   : > { %271 = vst.msk [vmem:[%s172_s25 + $0x8] sm:$0xff] %vm269_vm1, %v266_v7 }
  0xe9   : > { %270 = vst.msk [vmem:[%s172_s25] sm:$0xff] %vm269_vm1, %v261_v6 }
  0xea PF: > { %s13_s12 = sadd.s32 1, %s365_s12  }
  0xeb   : > { %p10_p4 = scmp.ge.s32.totalorder %s13_s12, 6  }
  0xed   :  { %12 = sbr.rel (!%p10_p4) target bundleno = 1 (0x1), region = 62 }

</bundles_post_ra>
